<compile_context>
chip_gen: v7x
topology: tpu7x:2x2x1
jax: 0.10.0
libtpu: 0.0.40
codegen_flags: <defaults>
</compile_context>

<pallas_src>
import functools

import jax
import jax.numpy as jnp
from jax import lax
from jax.experimental import pallas as pl
from jax.experimental.pallas import tpu as pltpu

EPS = 1e-5  # PyTorch BatchNorm2d default


# ---------------------------------------------------------------------------
# Fused kernel (one image per grid step), channel-major (C, H*W):
#   a        = relu( bn2( W1 @ relu(bn1(x)) ) )          (1x1 conv as matmul)
#   col      = im2col(a) via 9 lane-shifted, masked copies
#   conv_out = W2_im2col @ col                           (single 3x3-conv matmul)
#   o_ref    = [x | conv_out] on the channel (sublane) axis
# ---------------------------------------------------------------------------
def _bottleneck_fused_kernel(x_ref, s1_ref, b1_ref, w1_ref, s2_ref, b2_ref,
                             w2_ref, mask_ref, o_ref, a_buf_ref, col_ref,
                             *, W, HW, pad_l):
    Cin = x_ref.shape[0]
    Cmid = w1_ref.shape[0]

    x = x_ref[...]                                             # (Cin, HW)

    # --- bn1 + relu (folded scale/bias), then 1x1 conv: (Cmid,Cin)@(Cin,HW) ---
    h = jnp.maximum(x * s1_ref[...] + b1_ref[...], 0.0)
    a = jnp.dot(w1_ref[...], h, preferred_element_type=jnp.float32)
    # --- bn2 + relu ---
    a = jnp.maximum(a * s2_ref[...] + b2_ref[...], 0.0)        # (Cmid, HW)

    # Stage the activation once (lane-aligned interior store).  The border
    # lanes of the buffer are never zero-filled: every out-of-image tap
    # position is zeroed by the precomputed masks below, so reading the
    # uninitialized border is harmless (select is bitwise, NaN-safe).
    a_buf_ref[:, pad_l:pad_l + HW] = a

    # --- im2col: 9 lane-shifted copies into the col scratch, then ONE matmul ---
    for ky in range(3):
        for kx in range(3):
            k = ky * 3 + kx
            shift = (ky - 1) * W + (kx - 1)
            tap = a_buf_ref[:, pad_l + shift:pad_l + shift + HW]   # (Cmid, HW)
            if (ky, kx) != (1, 1):          # center tap is always fully valid
                valid = mask_ref[k:k + 1, :] != 0.0                # (1, HW)
                tap = jnp.where(valid, tap, 0.0)
            col_ref[k * Cmid:(k + 1) * Cmid, :] = tap

    conv_out = jnp.dot(w2_ref[...], col_ref[...],
                       preferred_element_type=jnp.float32)         # (Cout, HW)

    # --- fused channel concat [x | conv_out]: two sublane-slice stores ---
    o_ref[:Cin, :] = x.astype(o_ref.dtype)
    o_ref[Cin:, :] = conv_out.astype(o_ref.dtype)


@jax.jit
def bottleneck_block_forward(x_nchw, params):
    """Forward pass of BottleneckBlock. Input/output are NCHW (PyTorch layout)."""
    (g1, be1, m1, v1, w1, g2, be2, m2, v2, w2) = params
    N, Cin, H, W = x_nchw.shape
    Cmid = w1.shape[0]   # inter_planes = 4 * out_planes  (w1: (Cmid, Cin, 1, 1))
    Cout = w2.shape[0]   # out_planes                     (w2: (Cout, Cmid, 3, 3))
    Ctot = Cin + Cout
    HW = H * W

    # Padded staging buffer geometry: left pad rounded up to a lane tile so the
    # interior store is lane-aligned; right pad just needs >= W+1 lanes.
    pad_l = ((W + 1 + 127) // 128) * 128
    pad_r = W + 1

    # --- fold BN params into scale/bias (eval mode, running stats) ---
    s1 = g1 / jnp.sqrt(v1 + EPS)
    b1 = be1 - m1 * s1
    s2 = g2 / jnp.sqrt(v2 + EPS)
    b2 = be2 - m2 * s2

    # --- layout glue: all free reshapes / tiny weight transposes (no HBM pass
    # over the activations) ---
    x_flat = x_nchw.reshape(N, Cin, HW)                 # contiguous merge, free
    w1_mat = w1[:, :, 0, 0]                             # (Cmid, Cin)
    # (Cout, Cmid, 3, 3) -> (Cout, 3, 3, Cmid) -> (Cout, 9*Cmid); tap k=ky*3+kx
    # occupies columns [k*Cmid : (k+1)*Cmid], matching the im2col row blocks.
    w2_mat = jnp.transpose(w2, (0, 2, 3, 1)).reshape(Cout, 9 * Cmid)

    # --- per-tap validity masks (1.0 inside the image, 0.0 where the 3x3 tap
    # falls into the padding).  Constant-folded at compile time. ---
    yy = jnp.arange(H)
    xx = jnp.arange(W)
    masks = []
    for ky in range(3):
        for kx in range(3):
            vy = (yy + (ky - 1) >= 0) & (yy + (ky - 1) < H)         # (H,)
            vx = (xx + (kx - 1) >= 0) & (xx + (kx - 1) < W)         # (W,)
            masks.append((vy[:, None] & vx[None, :]).reshape(HW))
    tap_mask = jnp.stack(masks, axis=0).astype(jnp.float32)          # (9, HW)

    kernel = functools.partial(_bottleneck_fused_kernel, W=W, HW=HW, pad_l=pad_l)

    out_flat = pl.pallas_call(
        kernel,
        out_shape=jax.ShapeDtypeStruct((N, Ctot, HW), x_nchw.dtype),
        grid_spec=pltpu.PrefetchScalarGridSpec(
            num_scalar_prefetch=0,
            grid=(N,),
            in_specs=[
                pl.BlockSpec((None, Cin, HW), lambda n: (n, 0, 0)),    # x
                pl.BlockSpec((Cin, 1), lambda n: (0, 0)),              # s1
                pl.BlockSpec((Cin, 1), lambda n: (0, 0)),              # b1
                pl.BlockSpec((Cmid, Cin), lambda n: (0, 0)),           # W1
                pl.BlockSpec((Cmid, 1), lambda n: (0, 0)),             # s2
                pl.BlockSpec((Cmid, 1), lambda n: (0, 0)),             # b2
                pl.BlockSpec((Cout, 9 * Cmid), lambda n: (0, 0)),      # W2 (im2col)
                pl.BlockSpec((9, HW), lambda n: (0, 0)),               # tap masks
            ],
            out_specs=pl.BlockSpec((None, Ctot, HW), lambda n: (n, 0, 0)),
            scratch_shapes=[
                pltpu.VMEM((Cmid, pad_l + HW + pad_r), jnp.float32),   # staged act.
                pltpu.VMEM((9 * Cmid, HW), jnp.float32),               # im2col
            ],
        ),
        compiler_params=pltpu.CompilerParams(
            dimension_semantics=("parallel",),      # megacore-shard batch (v7x)
            vmem_limit_bytes=16 * 1024 * 1024,      # actual footprint < 1 MiB
        ),
    )(x_flat, s1.reshape(Cin, 1), b1.reshape(Cin, 1), w1_mat,
      s2.reshape(Cmid, 1), b2.reshape(Cmid, 1), w2_mat, tap_mask)

    # TODO(synk): dropout (dropRate > 0) not implemented; module default is 0.0.
    return out_flat.reshape(N, Ctot, H, W)


def _make_params(key, in_planes, out_planes):
    inter = out_planes * 4
    ks = jax.random.split(key, 6)
    g1 = jnp.ones((in_planes,), jnp.float32)
    be1 = jnp.zeros((in_planes,), jnp.float32)
    m1 = 0.1 * jax.random.normal(ks[0], (in_planes,), jnp.float32)
    v1 = 1.0 + 0.1 * jnp.abs(jax.random.normal(ks[1], (in_planes,), jnp.float32))
    w1 = 0.1 * jax.random.normal(ks[2], (inter, in_planes, 1, 1), jnp.float32)
    g2 = jnp.ones((inter,), jnp.float32)
    be2 = jnp.zeros((inter,), jnp.float32)
    m2 = 0.1 * jax.random.normal(ks[3], (inter,), jnp.float32)
    v2 = 1.0 + 0.1 * jnp.abs(jax.random.normal(ks[4], (inter,), jnp.float32))
    w2 = 0.1 * jax.random.normal(ks[5], (out_planes, inter, 3, 3), jnp.float32)
    return (g1, be1, m1, v1, w1, g2, be2, m2, v2, w2)


def _reference(x_nchw, params):
    """Pure-JAX reference (lax.conv) for correctness checking."""
    (g1, be1, m1, v1, w1, g2, be2, m2, v2, w2) = params
    def bn(x, g, b, m, v):
        return (x - m[None, :, None, None]) / jnp.sqrt(v[None, :, None, None] + EPS) \
               * g[None, :, None, None] + b[None, :, None, None]
    h = jax.nn.relu(bn(x_nchw, g1, be1, m1, v1))
    h = lax.conv_general_dilated(h, w1, (1, 1), "VALID",
                                 dimension_numbers=("NCHW", "OIHW", "NCHW"))
    h = jax.nn.relu(bn(h, g2, be2, m2, v2))
    h = lax.conv_general_dilated(h, w2, (1, 1), ((1, 1), (1, 1)),
                                 dimension_numbers=("NCHW", "OIHW", "NCHW"))
    return jnp.concatenate([x_nchw, h], axis=1)


if __name__ == "__main__":
    key = jax.random.PRNGKey(0)
    k_x, k_p = jax.random.split(key)

    N, in_planes, out_planes, H, W = 2, 4, 8, 16, 16
    x = jax.random.normal(k_x, (N, in_planes, H, W), jnp.float32)
    params = _make_params(k_p, in_planes, out_planes)

    out = bottleneck_block_forward(x, params)
    out = jax.block_until_ready(out)

    assert out.shape == (N, in_planes + out_planes, H, W), out.shape

    ref = jax.block_until_ready(_reference(x, params))
    import numpy as np
    np.testing.assert_allclose(np.asarray(out), np.asarray(ref),
                               rtol=1e-4, atol=1e-4)

    print("KERNEL_OK")
</pallas_src>

<mosaic_0001>
module attributes {stable_mosaic.version = 11 : i64} {
  func.func @_bottleneck_fused_kernel(%arg0: i32, %arg1: memref<1x4x256xf32, #tpu.memory_space<vmem>>, %arg2: memref<4x1xf32, #tpu.memory_space<vmem>>, %arg3: memref<4x1xf32, #tpu.memory_space<vmem>>, %arg4: memref<32x4xf32, #tpu.memory_space<vmem>>, %arg5: memref<32x1xf32, #tpu.memory_space<vmem>>, %arg6: memref<32x1xf32, #tpu.memory_space<vmem>>, %arg7: memref<8x288xf32, #tpu.memory_space<vmem>>, %arg8: memref<9x256xf32, #tpu.memory_space<vmem>>, %arg9: memref<1x12x256xf32, #tpu.memory_space<vmem>>, %arg10: memref<32x401xf32, #tpu.memory_space<vmem>>, %arg11: memref<288x256xf32, #tpu.memory_space<vmem>>) attributes {dimension_semantics = [#tpu.dimension_semantics<parallel>], iteration_bounds = array<i64: 2>, scalar_prefetch = 0 : i64, scratch_operands = 2 : i64, tpu.core_type = #tpu.core_type<tc>, window_params = [{transform_indices = @transform_0, window_bounds = array<i64: 1, 4, 256>}, {pipeline_mode = #tpu.pipeline_mode<synchronous>, transform_indices = @transform_1, window_bounds = array<i64: 4, 1>}, {pipeline_mode = #tpu.pipeline_mode<synchronous>, transform_indices = @transform_2, window_bounds = array<i64: 4, 1>}, {pipeline_mode = #tpu.pipeline_mode<synchronous>, transform_indices = @transform_3, window_bounds = array<i64: 32, 4>}, {pipeline_mode = #tpu.pipeline_mode<synchronous>, transform_indices = @transform_4, window_bounds = array<i64: 32, 1>}, {pipeline_mode = #tpu.pipeline_mode<synchronous>, transform_indices = @transform_5, window_bounds = array<i64: 32, 1>}, {pipeline_mode = #tpu.pipeline_mode<synchronous>, transform_indices = @transform_6, window_bounds = array<i64: 8, 288>}, {pipeline_mode = #tpu.pipeline_mode<synchronous>, transform_indices = @transform_7, window_bounds = array<i64: 9, 256>}, {transform_indices = @transform_8, window_bounds = array<i64: 1, 12, 256>}]} {
    %c0 = arith.constant 0 : index
    %c0_0 = arith.constant 0 : index
    %c0_1 = arith.constant 0 : index
    %0 = vector.load %arg1[%c0, %c0_0, %c0_1] : memref<1x4x256xf32, #tpu.memory_space<vmem>>, vector<1x4x256xf32>
    %1 = vector.shape_cast %0 : vector<1x4x256xf32> to vector<4x256xf32>
    %c0_2 = arith.constant 0 : index
    %c0_3 = arith.constant 0 : index
    %2 = vector.load %arg2[%c0_2, %c0_3] : memref<4x1xf32, #tpu.memory_space<vmem>>, vector<4x1xf32>
    %3 = vector.broadcast %2 : vector<4x1xf32> to vector<4x256xf32>
    %4 = arith.mulf %1, %3 : vector<4x256xf32>
    %c0_4 = arith.constant 0 : index
    %c0_5 = arith.constant 0 : index
    %5 = vector.load %arg3[%c0_4, %c0_5] : memref<4x1xf32, #tpu.memory_space<vmem>>, vector<4x1xf32>
    %6 = vector.broadcast %5 : vector<4x1xf32> to vector<4x256xf32>
    %7 = arith.addf %4, %6 : vector<4x256xf32>
    %cst = arith.constant 0.000000e+00 : f32
    %8 = vector.broadcast %cst : f32 to vector<4x256xf32>
    %9 = arith.maximumf %7, %8 : vector<4x256xf32>
    %c0_6 = arith.constant 0 : index
    %c0_7 = arith.constant 0 : index
    %10 = vector.load %arg4[%c0_6, %c0_7] : memref<32x4xf32, #tpu.memory_space<vmem>>, vector<32x4xf32>
    %cst_8 = arith.constant dense<0.000000e+00> : vector<32x256xf32>
    %11 = tpu.matmul %10, %9, %cst_8 {dimension_numbers = #tpu.dot_dimension_numbers<[1], [0], [0], [1], [0, 0, 1, 1], [], []>} : vector<32x4xf32>, vector<4x256xf32>, vector<32x256xf32> -> vector<32x256xf32>
    %c0_9 = arith.constant 0 : index
    %c0_10 = arith.constant 0 : index
    %12 = vector.load %arg5[%c0_9, %c0_10] : memref<32x1xf32, #tpu.memory_space<vmem>>, vector<32x1xf32>
    %13 = vector.broadcast %12 : vector<32x1xf32> to vector<32x256xf32>
    %14 = arith.mulf %11, %13 : vector<32x256xf32>
    %c0_11 = arith.constant 0 : index
    %c0_12 = arith.constant 0 : index
    %15 = vector.load %arg6[%c0_11, %c0_12] : memref<32x1xf32, #tpu.memory_space<vmem>>, vector<32x1xf32>
    %16 = vector.broadcast %15 : vector<32x1xf32> to vector<32x256xf32>
    %17 = arith.addf %14, %16 : vector<32x256xf32>
    %cst_13 = arith.constant 0.000000e+00 : f32
    %18 = vector.broadcast %cst_13 : f32 to vector<32x256xf32>
    %19 = arith.maximumf %17, %18 : vector<32x256xf32>
    %c0_14 = arith.constant 0 : index
    %c128 = arith.constant 128 : index
    %20 = vector.load %arg10[%c0_14, %c128] : memref<32x401xf32, #tpu.memory_space<vmem>>, vector<32x256xf32>
    tpu.vector_store %arg10[%c0_14, %c128], %19 {strides = array<i32>} : memref<32x401xf32, #tpu.memory_space<vmem>>, vector<32x256xf32>,
    %c0_15 = arith.constant 0 : index
    %c111 = arith.constant 111 : index
    %21 = vector.load %arg10[%c0_15, %c111] : memref<32x401xf32, #tpu.memory_space<vmem>>, vector<32x256xf32>
    %c0_16 = arith.constant 0 : index
    %c0_17 = arith.constant 0 : index
    %22 = vector.load %arg8[%c0_16, %c0_17] : memref<9x256xf32, #tpu.memory_space<vmem>>, vector<1x256xf32>
    %cst_18 = arith.constant 0.000000e+00 : f32
    %23 = vector.broadcast %cst_18 : f32 to vector<1x256xf32>
    %24 = arith.cmpf one, %22, %23 : vector<1x256xf32>
    %cst_19 = arith.constant 0.000000e+00 : f32
    %25 = vector.shape_cast %24 : vector<1x256xi1> to vector<1x256xi1>
    %26 = vector.broadcast %25 : vector<1x256xi1> to vector<32x256xi1>
    %27 = vector.broadcast %cst_19 : f32 to vector<32x256xf32>
    %28 = arith.select %26, %21, %27 : vector<32x256xi1>, vector<32x256xf32>
    %c0_20 = arith.constant 0 : index
    %c0_21 = arith.constant 0 : index
    %29 = vector.load %arg11[%c0_20, %c0_21] : memref<288x256xf32, #tpu.memory_space<vmem>>, vector<32x256xf32>
    tpu.vector_store %arg11[%c0_20, %c0_21], %28 {strides = array<i32>} : memref<288x256xf32, #tpu.memory_space<vmem>>, vector<32x256xf32>,
    %c0_22 = arith.constant 0 : index
    %c112 = arith.constant 112 : index
    %30 = vector.load %arg10[%c0_22, %c112] : memref<32x401xf32, #tpu.memory_space<vmem>>, vector<32x256xf32>
    %c1 = arith.constant 1 : index
    %c0_23 = arith.constant 0 : index
    %31 = vector.load %arg8[%c1, %c0_23] : memref<9x256xf32, #tpu.memory_space<vmem>>, vector<1x256xf32>
    %cst_24 = arith.constant 0.000000e+00 : f32
    %32 = vector.broadcast %cst_24 : f32 to vector<1x256xf32>
    %33 = arith.cmpf one, %31, %32 : vector<1x256xf32>
    %cst_25 = arith.constant 0.000000e+00 : f32
    %34 = vector.shape_cast %33 : vector<1x256xi1> to vector<1x256xi1>
    %35 = vector.broadcast %34 : vector<1x256xi1> to vector<32x256xi1>
    %36 = vector.broadcast %cst_25 : f32 to vector<32x256xf32>
    %37 = arith.select %35, %30, %36 : vector<32x256xi1>, vector<32x256xf32>
    %c32 = arith.constant 32 : index
    %c0_26 = arith.constant 0 : index
    %38 = vector.load %arg11[%c32, %c0_26] : memref<288x256xf32, #tpu.memory_space<vmem>>, vector<32x256xf32>
    tpu.vector_store %arg11[%c32, %c0_26], %37 {strides = array<i32>} : memref<288x256xf32, #tpu.memory_space<vmem>>, vector<32x256xf32>,
    %c0_27 = arith.constant 0 : index
    %c113 = arith.constant 113 : index
    %39 = vector.load %arg10[%c0_27, %c113] : memref<32x401xf32, #tpu.memory_space<vmem>>, vector<32x256xf32>
    %c2 = arith.constant 2 : index
    %c0_28 = arith.constant 0 : index
    %40 = vector.load %arg8[%c2, %c0_28] : memref<9x256xf32, #tpu.memory_space<vmem>>, vector<1x256xf32>
    %cst_29 = arith.constant 0.000000e+00 : f32
    %41 = vector.broadcast %cst_29 : f32 to vector<1x256xf32>
    %42 = arith.cmpf one, %40, %41 : vector<1x256xf32>
    %cst_30 = arith.constant 0.000000e+00 : f32
    %43 = vector.shape_cast %42 : vector<1x256xi1> to vector<1x256xi1>
    %44 = vector.broadcast %43 : vector<1x256xi1> to vector<32x256xi1>
    %45 = vector.broadcast %cst_30 : f32 to vector<32x256xf32>
    %46 = arith.select %44, %39, %45 : vector<32x256xi1>, vector<32x256xf32>
    %c64 = arith.constant 64 : index
    %c0_31 = arith.constant 0 : index
    %47 = vector.load %arg11[%c64, %c0_31] : memref<288x256xf32, #tpu.memory_space<vmem>>, vector<32x256xf32>
    tpu.vector_store %arg11[%c64, %c0_31], %46 {strides = array<i32>} : memref<288x256xf32, #tpu.memory_space<vmem>>, vector<32x256xf32>,
    %c0_32 = arith.constant 0 : index
    %c127 = arith.constant 127 : index
    %48 = vector.load %arg10[%c0_32, %c127] : memref<32x401xf32, #tpu.memory_space<vmem>>, vector<32x256xf32>
    %c3 = arith.constant 3 : index
    %c0_33 = arith.constant 0 : index
    %49 = vector.load %arg8[%c3, %c0_33] : memref<9x256xf32, #tpu.memory_space<vmem>>, vector<1x256xf32>
    %cst_34 = arith.constant 0.000000e+00 : f32
    %50 = vector.broadcast %cst_34 : f32 to vector<1x256xf32>
    %51 = arith.cmpf one, %49, %50 : vector<1x256xf32>
    %cst_35 = arith.constant 0.000000e+00 : f32
    %52 = vector.shape_cast %51 : vector<1x256xi1> to vector<1x256xi1>
    %53 = vector.broadcast %52 : vector<1x256xi1> to vector<32x256xi1>
    %54 = vector.broadcast %cst_35 : f32 to vector<32x256xf32>
    %55 = arith.select %53, %48, %54 : vector<32x256xi1>, vector<32x256xf32>
    %c96 = arith.constant 96 : index
    %c0_36 = arith.constant 0 : index
    %56 = vector.load %arg11[%c96, %c0_36] : memref<288x256xf32, #tpu.memory_space<vmem>>, vector<32x256xf32>
    tpu.vector_store %arg11[%c96, %c0_36], %55 {strides = array<i32>} : memref<288x256xf32, #tpu.memory_space<vmem>>, vector<32x256xf32>,
    %c0_37 = arith.constant 0 : index
    %c128_38 = arith.constant 128 : index
    %57 = vector.load %arg10[%c0_37, %c128_38] : memref<32x401xf32, #tpu.memory_space<vmem>>, vector<32x256xf32>
    %c128_39 = arith.constant 128 : index
    %c0_40 = arith.constant 0 : index
    %58 = vector.load %arg11[%c128_39, %c0_40] : memref<288x256xf32, #tpu.memory_space<vmem>>, vector<32x256xf32>
    tpu.vector_store %arg11[%c128_39, %c0_40], %57 {strides = array<i32>} : memref<288x256xf32, #tpu.memory_space<vmem>>, vector<32x256xf32>,
    %c0_41 = arith.constant 0 : index
    %c129 = arith.constant 129 : index
    %59 = vector.load %arg10[%c0_41, %c129] : memref<32x401xf32, #tpu.memory_space<vmem>>, vector<32x256xf32>
    %c5 = arith.constant 5 : index
    %c0_42 = arith.constant 0 : index
    %60 = vector.load %arg8[%c5, %c0_42] : memref<9x256xf32, #tpu.memory_space<vmem>>, vector<1x256xf32>
    %cst_43 = arith.constant 0.000000e+00 : f32
    %61 = vector.broadcast %cst_43 : f32 to vector<1x256xf32>
    %62 = arith.cmpf one, %60, %61 : vector<1x256xf32>
    %cst_44 = arith.constant 0.000000e+00 : f32
    %63 = vector.shape_cast %62 : vector<1x256xi1> to vector<1x256xi1>
    %64 = vector.broadcast %63 : vector<1x256xi1> to vector<32x256xi1>
    %65 = vector.broadcast %cst_44 : f32 to vector<32x256xf32>
    %66 = arith.select %64, %59, %65 : vector<32x256xi1>, vector<32x256xf32>
    %c160 = arith.constant 160 : index
    %c0_45 = arith.constant 0 : index
    %67 = vector.load %arg11[%c160, %c0_45] : memref<288x256xf32, #tpu.memory_space<vmem>>, vector<32x256xf32>
    tpu.vector_store %arg11[%c160, %c0_45], %66 {strides = array<i32>} : memref<288x256xf32, #tpu.memory_space<vmem>>, vector<32x256xf32>,
    %c0_46 = arith.constant 0 : index
    %c143 = arith.constant 143 : index
    %68 = vector.load %arg10[%c0_46, %c143] : memref<32x401xf32, #tpu.memory_space<vmem>>, vector<32x256xf32>
    %c6 = arith.constant 6 : index
    %c0_47 = arith.constant 0 : index
    %69 = vector.load %arg8[%c6, %c0_47] : memref<9x256xf32, #tpu.memory_space<vmem>>, vector<1x256xf32>
    %cst_48 = arith.constant 0.000000e+00 : f32
    %70 = vector.broadcast %cst_48 : f32 to vector<1x256xf32>
    %71 = arith.cmpf one, %69, %70 : vector<1x256xf32>
    %cst_49 = arith.constant 0.000000e+00 : f32
    %72 = vector.shape_cast %71 : vector<1x256xi1> to vector<1x256xi1>
    %73 = vector.broadcast %72 : vector<1x256xi1> to vector<32x256xi1>
    %74 = vector.broadcast %cst_49 : f32 to vector<32x256xf32>
    %75 = arith.select %73, %68, %74 : vector<32x256xi1>, vector<32x256xf32>
    %c192 = arith.constant 192 : index
    %c0_50 = arith.constant 0 : index
    %76 = vector.load %arg11[%c192, %c0_50] : memref<288x256xf32, #tpu.memory_space<vmem>>, vector<32x256xf32>
    tpu.vector_store %arg11[%c192, %c0_50], %75 {strides = array<i32>} : memref<288x256xf32, #tpu.memory_space<vmem>>, vector<32x256xf32>,
    %c0_51 = arith.constant 0 : index
    %c144 = arith.constant 144 : index
    %77 = vector.load %arg10[%c0_51, %c144] : memref<32x401xf32, #tpu.memory_space<vmem>>, vector<32x256xf32>
    %c7 = arith.constant 7 : index
    %c0_52 = arith.constant 0 : index
    %78 = vector.load %arg8[%c7, %c0_52] : memref<9x256xf32, #tpu.memory_space<vmem>>, vector<1x256xf32>
    %cst_53 = arith.constant 0.000000e+00 : f32
    %79 = vector.broadcast %cst_53 : f32 to vector<1x256xf32>
    %80 = arith.cmpf one, %78, %79 : vector<1x256xf32>
    %cst_54 = arith.constant 0.000000e+00 : f32
    %81 = vector.shape_cast %80 : vector<1x256xi1> to vector<1x256xi1>
    %82 = vector.broadcast %81 : vector<1x256xi1> to vector<32x256xi1>
    %83 = vector.broadcast %cst_54 : f32 to vector<32x256xf32>
    %84 = arith.select %82, %77, %83 : vector<32x256xi1>, vector<32x256xf32>
    %c224 = arith.constant 224 : index
    %c0_55 = arith.constant 0 : index
    %85 = vector.load %arg11[%c224, %c0_55] : memref<288x256xf32, #tpu.memory_space<vmem>>, vector<32x256xf32>
    tpu.vector_store %arg11[%c224, %c0_55], %84 {strides = array<i32>} : memref<288x256xf32, #tpu.memory_space<vmem>>, vector<32x256xf32>,
    %c0_56 = arith.constant 0 : index
    %c145 = arith.constant 145 : index
    %86 = vector.load %arg10[%c0_56, %c145] : memref<32x401xf32, #tpu.memory_space<vmem>>, vector<32x256xf32>
    %c8 = arith.constant 8 : index
    %c0_57 = arith.constant 0 : index
    %87 = vector.load %arg8[%c8, %c0_57] : memref<9x256xf32, #tpu.memory_space<vmem>>, vector<1x256xf32>
    %cst_58 = arith.constant 0.000000e+00 : f32
    %88 = vector.broadcast %cst_58 : f32 to vector<1x256xf32>
    %89 = arith.cmpf one, %87, %88 : vector<1x256xf32>
    %cst_59 = arith.constant 0.000000e+00 : f32
    %90 = vector.shape_cast %89 : vector<1x256xi1> to vector<1x256xi1>
    %91 = vector.broadcast %90 : vector<1x256xi1> to vector<32x256xi1>
    %92 = vector.broadcast %cst_59 : f32 to vector<32x256xf32>
    %93 = arith.select %91, %86, %92 : vector<32x256xi1>, vector<32x256xf32>
    %c256 = arith.constant 256 : index
    %c0_60 = arith.constant 0 : index
    %94 = vector.load %arg11[%c256, %c0_60] : memref<288x256xf32, #tpu.memory_space<vmem>>, vector<32x256xf32>
    tpu.vector_store %arg11[%c256, %c0_60], %93 {strides = array<i32>} : memref<288x256xf32, #tpu.memory_space<vmem>>, vector<32x256xf32>,
    %c0_61 = arith.constant 0 : index
    %c0_62 = arith.constant 0 : index
    %95 = vector.load %arg7[%c0_61, %c0_62] : memref<8x288xf32, #tpu.memory_space<vmem>>, vector<8x288xf32>
    %c0_63 = arith.constant 0 : index
    %c0_64 = arith.constant 0 : index
    %96 = vector.load %arg11[%c0_63, %c0_64] : memref<288x256xf32, #tpu.memory_space<vmem>>, vector<288x256xf32>
    %cst_65 = arith.constant dense<0.000000e+00> : vector<8x256xf32>
    %97 = tpu.matmul %95, %96, %cst_65 {dimension_numbers = #tpu.dot_dimension_numbers<[1], [0], [0], [1], [0, 0, 1, 1], [], []>} : vector<8x288xf32>, vector<288x256xf32>, vector<8x256xf32> -> vector<8x256xf32>
    %c0_66 = arith.constant 0 : index
    %c0_67 = arith.constant 0 : index
    %c0_68 = arith.constant 0 : index
    %98 = vector.load %arg9[%c0_66, %c0_67, %c0_68] : memref<1x12x256xf32, #tpu.memory_space<vmem>>, vector<1x4x256xf32>
    %99 = vector.shape_cast %98 : vector<1x4x256xf32> to vector<4x256xf32>
    %100 = vector.shape_cast %1 : vector<4x256xf32> to vector<1x4x256xf32>
    tpu.vector_store %arg9[%c0_66, %c0_67, %c0_68], %100 {strides = array<i32>} : memref<1x12x256xf32, #tpu.memory_space<vmem>>, vector<1x4x256xf32>,
    %c0_69 = arith.constant 0 : index
    %c4 = arith.constant 4 : index
    %c0_70 = arith.constant 0 : index
    %101 = vector.load %arg9[%c0_69, %c4, %c0_70] : memref<1x12x256xf32, #tpu.memory_space<vmem>>, vector<1x8x256xf32>
    %102 = vector.shape_cast %101 : vector<1x8x256xf32> to vector<8x256xf32>
    %103 = vector.shape_cast %97 : vector<8x256xf32> to vector<1x8x256xf32>
    tpu.vector_store %arg9[%c0_69, %c4, %c0_70], %103 {strides = array<i32>} : memref<1x12x256xf32, #tpu.memory_space<vmem>>, vector<1x8x256xf32>,
    return
  }
  func.func @transform_0(%arg0: i32) -> (i32, i32, i32) {
    %c0_i32 = arith.constant 0 : i32
    %c0_i32_0 = arith.constant 0 : i32
    %c0_i32_1 = arith.constant 0 : i32
    return %arg0, %c0_i32, %c0_i32_0 : i32, i32, i32
  }
  func.func @transform_1(%arg0: i32) -> (i32, i32) {
    %c0_i32 = arith.constant 0 : i32
    %c0_i32_0 = arith.constant 0 : i32
    %c0_i32_1 = arith.constant 0 : i32
    return %c0_i32, %c0_i32_0 : i32, i32
  }
  func.func @transform_2(%arg0: i32) -> (i32, i32) {
    %c0_i32 = arith.constant 0 : i32
    %c0_i32_0 = arith.constant 0 : i32
    %c0_i32_1 = arith.constant 0 : i32
    return %c0_i32, %c0_i32_0 : i32, i32
  }
  func.func @transform_3(%arg0: i32) -> (i32, i32) {
    %c0_i32 = arith.constant 0 : i32
    %c0_i32_0 = arith.constant 0 : i32
    %c0_i32_1 = arith.constant 0 : i32
    return %c0_i32, %c0_i32_0 : i32, i32
  }
  func.func @transform_4(%arg0: i32) -> (i32, i32) {
    %c0_i32 = arith.constant 0 : i32
    %c0_i32_0 = arith.constant 0 : i32
    %c0_i32_1 = arith.constant 0 : i32
    return %c0_i32, %c0_i32_0 : i32, i32
  }
  func.func @transform_5(%arg0: i32) -> (i32, i32) {
    %c0_i32 = arith.constant 0 : i32
    %c0_i32_0 = arith.constant 0 : i32
    %c0_i32_1 = arith.constant 0 : i32
    return %c0_i32, %c0_i32_0 : i32, i32
  }
  func.func @transform_6(%arg0: i32) -> (i32, i32) {
    %c0_i32 = arith.constant 0 : i32
    %c0_i32_0 = arith.constant 0 : i32
    %c0_i32_1 = arith.constant 0 : i32
    return %c0_i32, %c0_i32_0 : i32, i32
  }
  func.func @transform_7(%arg0: i32) -> (i32, i32) {
    %c0_i32 = arith.constant 0 : i32
    %c0_i32_0 = arith.constant 0 : i32
    %c0_i32_1 = arith.constant 0 : i32
    return %c0_i32, %c0_i32_0 : i32, i32
  }
  func.func @transform_8(%arg0: i32) -> (i32, i32, i32) {
    %c0_i32 = arith.constant 0 : i32
    %c0_i32_0 = arith.constant 0 : i32
    %c0_i32_1 = arith.constant 0 : i32
    return %arg0, %c0_i32, %c0_i32_0 : i32, i32, i32
  }
}

</mosaic_0001>

<bundles_post_ra>
// kernel: bottleneck_block_forward.1
= control target key start
LH: loop header
LB: loop body
LE: loop exit
PB: predicated region body
PF: predicated region fallthrough
CT: control target
= control target key end

     0   :  { %s2118_s27 = smov 0   ;;  %s2781_s0 = inlined_call_operand.vmem [shape: f32[2,4,256], index: 0, kind: input, shape index: {}]   ;;  %s2782_s1 = inlined_call_operand.vmem [shape: f32[4,1], index: 1, kind: input, shape index: {}]   ;;  %s2783_s2 = inlined_call_operand.vmem [shape: f32[4,1], index: 2, kind: input, shape index: {}]   ;;  %s2784_s3 = inlined_call_operand.vmem [shape: f32[32,4], index: 3, kind: input, shape index: {}]   ;;  %s2785_s4 = inlined_call_operand.vmem [shape: f32[32,1], index: 4, kind: input, shape index: {}]   ;;  %s2786_s5 = inlined_call_operand.vmem [shape: f32[32,1], index: 5, kind: input, shape index: {}]   ;;  %s2787_s6 = inlined_call_operand.vmem [shape: f32[8,288], index: 6, kind: input, shape index: {}]   ;;  %s2788_s7 = inlined_call_operand.vmem [shape: f32[9,256], index: 7, kind: input, shape index: {}]   ;;  %s2789_s8 = inlined_call_operand.vmem [shape: f32[2,12,256], index: 8, kind: output, shape index: {}]  }
   0x1 LB: > { %s1595_s28 = sadd.s32 4294967295, %s2060_s27   ;;  %p1599_p0 = scmp.ge.s32.totalorder %s2060_s27, 1  ;;  %s2060_s27 = sphi %s2118_s27, %s18_s27  }
   0x2   : > { %p262_p1 = scmp.lt.s32.totalorder %s2060_s27, 3 }
   0x4   : > { %p263_p2 = pnand %p1599_p0, %p262_p1 }
   0x5   : > { %v307_v0 = vld [vmem:[%s2782_s1] sm:$0xf] (!%p263_p2)  ;;  %v2062_v1 = vmov (!%p263_p2), 0   ;;  %p296_p3 = scmp.lt.s32.totalorder (!%p263_p2), %s1595_s28, 1  ;;  %v451_v6 = vld [vmem:[%s2785_s4 + $0x10] sm:$0xff] (!%p263_p2)  ;;  %v2063_v8 = vmov (!%p263_p2), 0.0   ;;  %v315_v16 = vlaneseq (!%p263_p2) }
   0x6   : > { %266 = sbr.rel (%p263_p2) target bundleno = 791 (0x317), region = 52  ;;  %1811 = vset.pattern.permute.xlu0 (!%p263_p2), %v2062_v1  ;;  %1812 = vset.pattern.permute.xlu1 (!%p263_p2), %v2062_v1  ;;  %v321_v2 = vld [vmem:[%s2783_s2] sm:$0xf] (!%p263_p2)  ;;  %v483_v7 = vld [vmem:[%s2786_s5 + $0x10] sm:$0xff] (!%p263_p2)  ;;  %v450_v10 = vld [vmem:[%s2785_s4 + $0x8] sm:$0xff] (!%p263_p2)  ;;  %vm355_vm0 = vcmask (!%p263_p2), 1043456  }
   0x7   : > { %310 = vperm.xlu0 (!%p263_p2), %1811, %v307_v0   ;;  %v481_v3 = vld [vmem:[%s2786_s5] sm:$0xff] (!%p263_p2)  ;;  %424 = vmatprep.mubr.f32.mxu0 (!%p263_p2), %v2063_v8  ;;  %v482_v11 = vld [vmem:[%s2786_s5 + $0x8] sm:$0xff] (!%p263_p2)  ;;  %v452_v12 = vld [vmem:[%s2785_s4 + $0x18] sm:$0xff] (!%p263_p2)  ;;  %v2064_v14 = vmov (!%p263_p2), 839922192   ;;  %v2168_v18 = vshrl.u32 (!%p263_p2), %v315_v16, 7 }
   0x8   : > { %v449_v9 = vld [vmem:[%s2785_s4] sm:$0xff] (!%p263_p2)  ;;  %v484_v13 = vld [vmem:[%s2786_s5 + $0x18] sm:$0xff] (!%p263_p2)  ;;  %v313_v15 = vunpack.c.l.s4 (!%p263_p2), %v2064_v14  ;;  %vm342_vm1 = vcmask (!%p263_p2), 31744   ;;  %v337_v29 = vld [vmem:[%s2784_s3 + $0x8] sm:$0xff] (!%p263_p2)  ;;  %s2065_s23 = smov (!%p263_p2), 17   ;;  %s2066_s24 = smov (!%p263_p2), 16  }
   0x9   : > { %455 = vperm.xlu1 (!%p263_p2), %1812, %v449_v9   ;;  %v336_v28 = vld [vmem:[%s2784_s3] sm:$0xff] (!%p263_p2)  ;;  %v338_v30 = vld [vmem:[%s2784_s3 + $0x10] sm:$0xff] (!%p263_p2)  ;;  %v339_v31 = vld [vmem:[%s2784_s3 + $0x18] sm:$0xff] (!%p263_p2)  ;;  %s2067_s25 = smov (!%p263_p2), 15   ;;  %s2068_s26 = smov (!%p263_p2), 1   ;;  %vm590_vm4 = vcmask (!%p263_p2), 138240  }
   0xa   : > { %v314_v17 = vunpack.c.0.s8 (!%p263_p2), %v313_v15  ;;  %v529_v32 = vld [vmem:[#allocation2] sm:$0xff] (!%p263_p2)  ;;  %s2070_s29 = smov (!%p263_p2), 113   ;;  %s2071_s30 = smov (!%p263_p2), 112   ;;  %vm685_vm10 = vcmask (!%p263_p2), 130048  }
   0xb   : > { %324 = vperm.xlu0 (!%p263_p2), %1811, %v321_v2   ;;  %v532_v33 = vld [vmem:[#allocation2 + $0x20] sm:$0xff] (!%p263_p2)  ;;  %s2072_s9 = smov (!%p263_p2), 111  }
   0xc   : > { %v317_v19 = vsub.s32 (!%p263_p2), %v314_v17, %v2168_v18  ;;  %v1813_v34 = vpack.i.bf16 (!%p263_p2), %v532_v33, %v529_v32  ;;  %v535_v35 = vld [vmem:[#allocation2 + $0x40] sm:$0xff] (!%p263_p2)  ;;  %v935_v32 = vld [vmem:[#allocation2 + $0x78] sm:$0xff] (!%p263_p2) }
   0xd   : > { %s2823_s28 = smov (!%p296_p3, %s1595_s28), 1  ;;  %460 = vperm.xlu1 %1812, %v450_v10   ;;  %v538_v36 = vld [vmem:[#allocation2 + $0x60] sm:$0xff] }
   0xe   : > { %s1620_s11 = sshll.u32 %s2823_s28, 3  ;;  %s1621_s12 = sshll.u32 %s2823_s28, 5  ;;  %v1818_v37 = vpack.i.bf16 %v538_v36, %v535_v35 }
   0xf   : > { %s300_s15 = scalar_lea.vmem %s2781_s0, %s1620_s11  ;;  %s2140_s18 = scalar_lea.vmem %s2789_s8, %s1621_s12  ;;  %487 = vperm.xlu0 %1811, %v481_v3  }
  0x10   : > { %v306_v4 = vld [vmem:[%s300_s15] sm:$0xff]  ;;  %s2069_s28 = smov 127  }
  0x11   : > { %v1526_v5 = vcombine.high %v306_v4, %v306_v4  ;;  %1528 = vst [vmem:[%s2140_s18] sm:$0xf] %v306_v4  ;;  %492 = vperm.xlu1 %1812, %v482_v11  }
  0x13   : > { %1529 = vst [vmem:[%s2140_s18 + $0x8] sm:$0xf] %v1526_v5  ;;  %465 = vperm.xlu0 %1811, %v451_v6  }
  0x15   : > { %470 = vperm.xlu1 %1812, %v452_v12  }
  0x17   : > { %497 = vperm.xlu0 %1811, %v483_v7  }
  0x19   : > { %502 = vperm.xlu1 %1812, %v484_v13  }
  0x1b   : > { %1814 = vrot.lane.b32.xlu0 %v1813_v34, %s2065_s23 }
  0x1d   : > { %1819 = vrot.lane.b32.xlu1 %v1818_v37, %s2065_s23 }
  0x1f   : > { %1824 = vrot.lane.b32.xlu0 %v1813_v34, %s2066_s24 }
  0x21   : > { %1829 = vrot.lane.b32.xlu1 %v1818_v37, %s2066_s24 }
  0x23   : > { %1834 = vrot.lane.b32.xlu0 %v1813_v34, %s2067_s25 }
  0x25   : > { %1839 = vrot.lane.b32.xlu1 %v1818_v37, %s2067_s25 }
  0x27   : > { %1844 = vrot.lane.b32.xlu0 %v1813_v34, %s2068_s26  ;;  %v1305_v34 = vld [vmem:[%s2787_s6 + $0x8] sm:$0xff] }
  0x28   : > { %1447 = vmatprep.mubr.f32.mxu1 %v1305_v34 }
  0x29   : > { %1849 = vrot.lane.b32.xlu1 %v1818_v37, %s2068_s26 }
  0x86   : > { %v311_v20 = vpop.permute.xlu0 %310 }
  0x87   : > { %v318_v21 = vrot.slane %v311_v20, %v317_v19 }
  0x88   : > { %v456_v38 = vpop.permute.xlu1 %455 }
  0x89   : > { %v320_v23 = vmul.f32 %v318_v21, %v306_v4 }
  0x8a   : > { %v325_v22 = vpop.permute.xlu0 %324 }
  0x8b   : > { %v332_v24 = vrot.slane %v325_v22, %v317_v19 }
  0x8c   : > { %v461_v39 = vpop.permute.xlu1 %460 }
  0x8d   : > { %v334_v25 = vadd.f32 %v332_v24, %v320_v23 }
  0x8e   : > { %v488_v40 = vpop.permute.xlu0 %487 }
  0x8f   : > { %v335_v26 = vmax.f32 %v334_v25, 0.0 }
  0x90   : > { %v493_v44 = vpop.permute.xlu1 %492 }
  0x91   : > { %v341_v27 = vcombine.high %v335_v26, %v335_v26 }
  0x92   : > { %v466_v47 = vpop.permute.xlu0 %465 }
  0x93   : > { %1604 = vmatprep.subr.msk.mxu0 %vm355_vm0, %v341_v27 }
  0x94   : > { %1605 = vmatpush1.msk.msra.mxu0 %vm355_vm0, %v335_v26  ;;  %v471_v56 = vpop.permute.xlu1 %470  ;;  %v926_v26 = vld [vmem:[#allocation2 + $0x18] sm:$0xff]  ;;  %vm780_vm0 = vcmask 121856  }
  0x95   : > { %1606 = vmatmul.mubr.msk.f32.vlgmr.msra.gmra.mrb[0].mxu0 %vm342_vm1, %v336_v28  ;;  %v929_v28 = vld [vmem:[#allocation2 + $0x38] sm:$0xff] }
  0x96   : > { %430 = vmatprep.mubr.f32.mxu0 %v2063_v8  ;;  %v498_v63 = vpop.permute.xlu0 %497 }
  0x98   : > { %v503_v13 = vpop.permute.xlu1 %502 }
  0x99   : > { %1607 = vmatmul.mubr.msk.f32.gmra.mrb[2].mxu0 %vm342_vm1, %v337_v29 }
  0x9a   : > { %436 = vmatprep.mubr.f32.mxu0 %v2063_v8  ;;  %v1815_v35 = vpop.permute.xlu0 %1814 }
  0x9c   : > { %v2256_v36 = vpop.permute.xlu1 %1819 }
  0x9d   : > { %1608 = vmatmul.mubr.msk.f32.gmra.mrb[4].mxu0 %vm342_vm1, %v338_v30  ;;  %v932_v30 = vld [vmem:[#allocation2 + $0x58] sm:$0xff] }
  0x9e   : > { %442 = vmatprep.mubr.f32.mxu0 %v2063_v8  ;;  %v2258_v37 = vpop.permute.xlu0 %1824 }
  0xa1   : > { %1609 = vmatmul.mubr.msk.f32.gmra.mrb[6].mxu0 %vm342_vm1, %v339_v31 }
  0xa2   : > { %1518 = vmatprep.mubr.f32.mxu0 %v2063_v8 }
 0x168   : > { %v426_v41 = vpop.f32.mrb[0].mxu0 }
 0x169   : > { %v473_v42 = vmul.f32 %v456_v38, %v426_v41  ;;  %v428_v43 = vpop.f32.mrb[1].mxu0 }
 0x16a   : > { %v474_v45 = vmul.f32 %v456_v38, %v428_v43  ;;  %v2260_v38 = vpop.permute.xlu1 %1829  ;;  %v2272_v43 = vsub.s32 1, %v2168_v18 }
 0x16b   : > { %v505_v46 = vadd.f32 %v488_v40, %v473_v42 }
 0x16c   : > { %v506_v48 = vadd.f32 %v488_v40, %v474_v45  ;;  %v432_v49 = vpop.f32.mrb[2].mxu0  ;;  %v541_v40 = vld [vmem:[%s2788_s7] ss:$8 sm:$0x3] }
 0x16d   : > { %v2191_v50 = vmax.f32 %v505_v46, 0.0  ;;  %v475_v51 = vmul.f32 %v461_v39, %v432_v49  ;;  %v434_v52 = vpop.f32.mrb[3].mxu0  ;;  %vm542_vm2 = vcmp.ne.f32.partialorder %v541_v40, 0.0 }
 0x16e   : > { %v2193_v53 = vmax.f32 %v506_v48, 0.0  ;;  %v476_v54 = vmul.f32 %v461_v39, %v434_v52  ;;  %v2262_v39 = vpop.permute.xlu0 %1834  ;;  %v2267_v41 = vpop.permute.xlu1 %1839  ;;  %v543_v45 = vsel %vm542_vm2, 1, %v2062_v1 }
 0x16f   : > { %v507_v55 = vadd.f32 %v493_v44, %v475_v51  ;;  %v551_v48 = vrot.slane %v543_v45, %v2272_v43 }
 0x170   : > { %v508_v57 = vadd.f32 %v493_v44, %v476_v54  ;;  %v438_v58 = vpop.f32.mrb[4].mxu0  ;;  %v1853_v59 = vpack.i.bf16 %v2193_v53, %v2191_v50  ;;  %v1918_v27 = vpack.i.bf16 %v926_v26, %v2193_v53  ;;  %v2275_v44 = vsub.s32 0, %v2168_v18 }
 0x171   : > { %v2197_v60 = vmax.f32 %v507_v55, 0.0  ;;  %v477_v61 = vmul.f32 %v466_v47, %v438_v58  ;;  %v440_v62 = vpop.f32.mrb[5].mxu0  ;;  %v1817_v54 = vunpack.i.h.bf16 %v1815_v35  ;;  %vm2284_vm3 = vcmp.eq.s32.totalorder %v551_v48, 1 }
 0x172   : > { %v2199_v0 = vmax.f32 %v508_v57, 0.0  ;;  %v478_v2 = vmul.f32 %v466_v47, %v440_v62  ;;  %1854 = vrot.lane.b32.xlu0 %v1853_v59, %s2065_s23  ;;  %v2269_v42 = vpop.permute.xlu0 %1844  ;;  %v2278_v46 = vpop.permute.xlu1 %1849  ;;  %v547_v49 = vrot.slane %v543_v45, %v2275_v44  ;;  %v1816_v18 = vunpack.i.l.bf16 %v1815_v35  ;;  %vm1687_vm6 = vmpackc.low %vm2284_vm3, %vm2284_vm3 }
 0x173   : > { %v509_v3 = vadd.f32 %v498_v63, %v477_v61  ;;  %v2204_v4 = vpack.i.bf16 %v2197_v60, %v2191_v50  ;;  %v1736_v5 = vpack.c.bf16 %v2197_v60, %v2191_v50  ;;  %v1832_v45 = vunpack.i.h.bf16 %v2260_v38  ;;  %v1306_v50 = vld [vmem:[%s2787_s6 + $0x10] sm:$0xff] }
 0x174   : > { %v510_v6 = vadd.f32 %v498_v63, %v478_v2  ;;  %v444_v7 = vpop.f32.mrb[6].mxu0  ;;  %v1873_v8 = vpack.i.bf16 %v2199_v0, %v2197_v60  ;;  %v1734_v9 = vpack.c.bf16 %v2199_v0, %v2193_v53  ;;  %v1923_v29 = vpack.i.bf16 %v929_v28, %v2199_v0 }
 0x175   : > { %v2212_v10 = vmax.f32 %v509_v3, 0.0  ;;  %v479_v11 = vmul.f32 %v471_v56, %v444_v7  ;;  %v446_v12 = vpop.f32.mrb[7].mxu0  ;;  %vm2288_vm5 = vcmp.eq.s32.totalorder %v547_v49, 1  ;;  %v1831_v49 = vunpack.i.l.bf16 %v2260_v38 }
 0x176   : > { %v2214_v14 = vmax.f32 %v510_v6, 0.0  ;;  %v480_v15 = vmul.f32 %v471_v56, %v446_v12  ;;  %1859 = vrot.lane.b32.xlu0 %v1853_v59, %s2066_s24  ;;  %1874 = vrot.lane.b32.xlu1 %v1873_v8, %s2065_s23  ;;  %vm1690_vm7 = vmpackc.low %vm2288_vm5, %vm2288_vm5  ;;  %vm875_vm5 = vcmask 7168  }
 0x177   : > { %v511_v16 = vadd.f32 %v503_v13, %v479_v11  ;;  %v1610_v11 = vld [vmem:[%s2788_s7 + $0x1] ss:$8 sm:$0x3] }
 0x178   : > { %v512_v17 = vadd.f32 %v503_v13, %v480_v15  ;;  %v1893_v19 = vpack.i.bf16 %v2214_v14, %v2212_v10  ;;  %v1938_v31 = vpack.i.bf16 %v932_v30, %v2214_v14  ;;  %vm637_vm8 = vcmp.ne.f32.partialorder %v1610_v11, 0.0  ;;  %v1612_v11 = vld [vmem:[%s2788_s7 + $0x3] ss:$8 sm:$0x3] }
 0x179   : > { %v2220_v20 = vmax.f32 %v511_v16, 0.0  ;;  %v638_v15 = vsel %vm637_vm8, 1, %v2062_v1  ;;  %vm827_vm15 = vcmp.ne.f32.partialorder %v1612_v11, 0.0 }
 0x17a   : > { %v2222_v21 = vmax.f32 %v512_v17, 0.0  ;;  %1864 = vrot.lane.b32.xlu0 %v1853_v59, %s2067_s25  ;;  %1879 = vrot.lane.b32.xlu1 %v1873_v8, %s2066_s24  ;;  %v646_v28 = vrot.slane %v638_v15, %v2272_v43 }
 0x17b   : > { %v1943_v22 = vpack.i.bf16 %v2220_v20, %v2212_v10  ;;  %v1740_v23 = vpack.c.bf16 %v2220_v20, %v2212_v10 }
 0x17c   : > { %v1913_v24 = vpack.i.bf16 %v2222_v21, %v2220_v20  ;;  %v1738_v25 = vpack.c.bf16 %v2222_v21, %v2214_v14  ;;  %v2003_v33 = vpack.i.bf16 %v935_v32, %v2222_v21  ;;  %v1826_v32 = vunpack.i.l.bf16 %v2258_v37 }
 0x17d   : > { %vm2340_vm11 = vcmp.eq.s32.totalorder %v646_v28, 1 }
 0x17e   : > { %1869 = vrot.lane.b32.xlu0 %v1853_v59, %s2068_s26  ;;  %1884 = vrot.lane.b32.xlu1 %v1873_v8, %s2067_s25  ;;  %vm1699_vm13 = vmpackc.low %vm2340_vm11, %vm2340_vm11 }
 0x182   : > { %1889 = vrot.lane.b32.xlu1 %v1873_v8, %s2068_s26  ;;  %1914 = vrot.lane.b32.xlu0 %v1913_v24, %s2065_s23 }
 0x186   : > { %1894 = vrot.lane.b32.xlu1 %v1893_v19, %s2065_s23  ;;  %1919 = vrot.lane.b32.xlu0 %v1918_v27, %s2069_s28 }
 0x18a   : > { %1899 = vrot.lane.b32.xlu1 %v1893_v19, %s2066_s24  ;;  %1929 = vrot.lane.b32.xlu0 %v1913_v24, %s2066_s24 }
 0x18e   : > { %1904 = vrot.lane.b32.xlu1 %v1893_v19, %s2067_s25  ;;  %1934 = vrot.lane.b32.xlu0 %v2204_v4, %s2069_s28 }
 0x192   : > { %1909 = vrot.lane.b32.xlu1 %v1893_v19, %s2068_s26  ;;  %1949 = vrot.lane.b32.xlu0 %v1913_v24, %s2067_s25  ;;  %v1611_v19 = vld [vmem:[%s2788_s7 + $0x2] ss:$8 sm:$0x3] }
 0x193   : > { %vm732_vm9 = vcmp.ne.f32.partialorder %v1611_v19, 0.0 }
 0x196   : > { %1924 = vrot.lane.b32.xlu1 %v1923_v29, %s2069_s28  ;;  %1954 = vrot.lane.b32.xlu0 %v1918_v27, %s2070_s29 }
 0x19a   : > { %1939 = vrot.lane.b32.xlu1 %v1938_v31, %s2069_s28  ;;  %1964 = vrot.lane.b32.xlu0 %v1913_v24, %s2068_s26  ;;  %v1821_v24 = vunpack.i.l.bf16 %v2256_v36 }
 0x19e   : > { %1944 = vrot.lane.b32.xlu1 %v1943_v22, %s2069_s28  ;;  %1969 = vrot.lane.b32.xlu0 %v2204_v4, %s2070_s29 }
 0x1a2   : > { %1959 = vrot.lane.b32.xlu1 %v1923_v29, %s2070_s29  ;;  %1984 = vrot.lane.b32.xlu0 %v1918_v27, %s2071_s30 }
 0x1a6   : > { %1974 = vrot.lane.b32.xlu1 %v1938_v31, %s2070_s29  ;;  %1994 = vrot.lane.b32.xlu0 %v1918_v27, %s2072_s9 }
 0x1aa   : > { %1979 = vrot.lane.b32.xlu1 %v1943_v22, %s2070_s29  ;;  %2004 = vrot.lane.b32.xlu0 %v2003_v33, %s2069_s28 }
 0x1ae   : > { %1989 = vrot.lane.b32.xlu1 %v1923_v29, %s2071_s30  ;;  %2009 = vrot.lane.b32.xlu0 %v2204_v4, %s2071_s30 }
 0x1b2   : > { %1999 = vrot.lane.b32.xlu1 %v1923_v29, %s2072_s9  ;;  %2019 = vrot.lane.b32.xlu0 %v2003_v33, %s2070_s29  ;;  %v1827_v29 = vunpack.i.h.bf16 %v2258_v37 }
 0x1b6   : > { %2014 = vrot.lane.b32.xlu1 %v2204_v4, %s2072_s9  ;;  %2024 = vrot.lane.b32.xlu0 %v1938_v31, %s2071_s30 }
 0x1ba   : > { %2034 = vrot.lane.b32.xlu1 %v2003_v33, %s2071_s30  ;;  %2029 = vrot.lane.b32.xlu0 %v1938_v31, %s2072_s9 }
 0x1be   : > { %2039 = vrot.lane.b32.xlu1 %v2003_v33, %s2072_s9  ;;  %2044 = vrot.lane.b32.xlu0 %v1943_v22, %s2071_s30 }
 0x1c2   : > { %2049 = vrot.lane.b32.xlu1 %v1943_v22, %s2072_s9  ;;  %v1822_v22 = vunpack.i.h.bf16 %v2256_v36  ;;  %v642_v36 = vrot.slane %v638_v15, %v2275_v44 }
 0x1c4   : > { %vm2350_vm12 = vcmp.eq.s32.totalorder %v642_v36, 1  ;;  %v828_v36 = vsel %vm827_vm15, 1, %v2062_v1  ;;  %vm1081_vm15 = vcmask 924672  }
 0x1c5   : > { %vm1702_vm14 = vmpackc.low %vm2350_vm12, %vm2350_vm12  ;;  %v836_v37 = vrot.slane %v828_v36, %v2272_v43 }
 0x1e4   : > { %v1855_v47 = vpop.permute.xlu0 %1854 }
 0x1e5   : > { %v1857_v51 = vunpack.i.h.bf16 %v1855_v47  ;;  %v1856_v52 = vunpack.i.l.bf16 %v1855_v47 }
 0x1e7   : > { %v592_v62 = vsel %vm590_vm4, %v1856_v52, %v1857_v51  ;;  %v591_v2 = vsel %vm590_vm4, %v1816_v18, %v1856_v52  ;;  %v733_v52 = vsel %vm732_vm9, 1, %v2062_v1 }
 0x1e8   : > { %v2282_v55 = vpop.permute.xlu0 %1859  ;;  %v1875_v56 = vpop.permute.xlu1 %1874  ;;  %v741_v19 = vrot.slane %v733_v52, %v2272_v43 }
 0x1e9   : > { %v1877_v58 = vunpack.i.h.bf16 %v1875_v56  ;;  %v1876_v59 = vunpack.i.l.bf16 %v1875_v56  ;;  %v1862_v33 = vunpack.i.h.bf16 %v2282_v55  ;;  %v1861_v34 = vunpack.i.l.bf16 %v2282_v55 }
 0x1ea   : > { %vm2392_vm1 = vcmp.eq.s32.totalorder %v741_v19, 1 }
 0x1eb   : > { %v594_v63 = vsel %vm590_vm4, %v1876_v59, %v1877_v58  ;;  %v593_v3 = vsel %vm590_vm4, %v1817_v54, %v1876_v59  ;;  %v687_v58 = vsel %vm685_vm10, %v1861_v34, %v1862_v33  ;;  %v686_v57 = vsel %vm685_vm10, %v1826_v32, %v1861_v34  ;;  %vm1711_vm3 = vmpackc.low %vm2392_vm1, %vm2392_vm1  ;;  %v1614_v34 = vld [vmem:[%s2788_s7 + $0x6] ss:$8 sm:$0x3] }
 0x1ec   : > { %v2299_v4 = vpop.permute.xlu0 %1864  ;;  %v1880_v6 = vpop.permute.xlu1 %1879  ;;  %v1686_v7 = vpack.c.bf16 %v594_v63, %v592_v62  ;;  %v1689_v8 = vpack.c.bf16 %v593_v3, %v591_v2  ;;  %vm1033_vm11 = vcmp.ne.f32.partialorder %v1614_v34, 0.0 }
 0x1ed   : > { %v1882_v26 = vunpack.i.h.bf16 %v1880_v6  ;;  %v1881_v27 = vunpack.i.l.bf16 %v1880_v6 }
 0x1ee   : > { %1688 = vmatprep.subr.msk.bf16.mxu1 %vm1687_vm6, %v1686_v7 }
 0x1ef   : > { %1691 = vmatpush1.bf16.msk.msra.mxu1 %vm1690_vm7, %v1689_v8  ;;  %v689_v51 = vsel %vm685_vm10, %v1881_v27, %v1882_v26  ;;  %v688_v15 = vsel %vm685_vm10, %v1827_v29, %v1881_v27  ;;  %v1867_v27 = vunpack.i.h.bf16 %v2299_v4  ;;  %v1866_v29 = vunpack.i.l.bf16 %v2299_v4 }
 0x1f0   : > { %v2317_v12 = vpop.permute.xlu0 %1869  ;;  %v2319_v13 = vpop.permute.xlu1 %1884  ;;  %v1701_v61 = vpack.c.bf16 %v688_v15, %v686_v57 }
 0x1f1   : > { %v1886_v26 = vunpack.i.l.bf16 %v2319_v13 }
 0x1f4   : > { %v2322_v16 = vpop.permute.xlu1 %1889  ;;  %v1915_v17 = vpop.permute.xlu0 %1914 }
 0x1f5   : > { %v1917_v30 = vunpack.i.h.bf16 %v1915_v17  ;;  %v1916_v31 = vunpack.i.l.bf16 %v1915_v17  ;;  %v1698_v17 = vpack.c.bf16 %v689_v51, %v687_v58  ;;  %v1836_v58 = vunpack.i.l.bf16 %v2262_v39 }
 0x1f7   : > { %v597_v54 = vsel %vm590_vm4, %v1822_v22, %v1916_v31  ;;  %v598_v55 = vsel %vm590_vm4, %v1916_v31, %v1917_v30  ;;  %v737_v22 = vrot.slane %v733_v52, %v2275_v44 }
 0x1f8   : > { %v1895_v35 = vpop.permute.xlu1 %1894  ;;  %v2334_v40 = vpop.permute.xlu0 %1919 }
 0x1f9   : > { %v1897_v47 = vunpack.i.h.bf16 %v1895_v35  ;;  %v1896_v48 = vunpack.i.l.bf16 %v1895_v35  ;;  %vm2412_vm2 = vcmp.eq.s32.totalorder %v737_v22, 1 }
 0x1fb   : > { %v595_v56 = vsel %vm590_vm4, %v1821_v24, %v1896_v48  ;;  %v596_v18 = vsel %vm590_vm4, %v1896_v48, %v1897_v47  ;;  %v1887_v24 = vunpack.i.h.bf16 %v2319_v13  ;;  %v1837_v47 = vunpack.i.h.bf16 %v2262_v39  ;;  %vm1714_vm4 = vmpackc.low %vm2412_vm2, %vm2412_vm2 }
 0x1fc   : > { %v1692_v59 = vpack.c.bf16 %v598_v55, %v596_v18  ;;  %v1695_v38 = vpack.c.bf16 %v597_v54, %v595_v56  ;;  %v1900_v62 = vpop.permute.xlu1 %1899  ;;  %v1930_v63 = vpop.permute.xlu0 %1929  ;;  %v782_v48 = vsel %vm780_vm0, %v1866_v29, %v1867_v27  ;;  %v781_v39 = vsel %vm780_vm0, %v1836_v58, %v1866_v29 }
 0x1fd   : > { %v1902_v3 = vunpack.i.h.bf16 %v1900_v62  ;;  %v1901_v6 = vunpack.i.l.bf16 %v1900_v62  ;;  %v1932_v7 = vunpack.i.h.bf16 %v1930_v63  ;;  %v1931_v8 = vunpack.i.l.bf16 %v1930_v63 }
 0x1fe   : > { %1694 = vmatprep.subr.msk.bf16.mxu1 %vm1687_vm6, %v1692_v59  ;;  %v784_v35 = vsel %vm780_vm0, %v1886_v26, %v1887_v24  ;;  %v783_v59 = vsel %vm780_vm0, %v1837_v47, %v1886_v26  ;;  %v1842_v62 = vunpack.i.h.bf16 %v2267_v41  ;;  %v1892_v63 = vunpack.i.h.bf16 %v2322_v16 }
 0x1ff   : > { %v691_v28 = vsel %vm685_vm10, %v1901_v6, %v1902_v3  ;;  %v693_v30 = vsel %vm685_vm10, %v1931_v8, %v1932_v7  ;;  %1697 = vmatpush1.bf16.msk.msra.mxu1 %vm1690_vm7, %v1695_v38  ;;  %v690_v13 = vsel %vm685_vm10, %v1831_v49, %v1901_v6  ;;  %v692_v4 = vsel %vm685_vm10, %v1832_v45, %v1931_v8 }
 0x200   : > { %v1905_v31 = vpop.permute.xlu1 %1904  ;;  %v2380_v33 = vpop.permute.xlu0 %1934  ;;  %1700 = vmatprep.subr.msk.bf16.mxu1 %vm1699_vm13, %v1698_v17  ;;  %v1704_v32 = vpack.c.bf16 %v693_v30, %v691_v28  ;;  %v1707_v45 = vpack.c.bf16 %v692_v4, %v690_v13  ;;  %v1710_v38 = vpack.c.bf16 %v784_v35, %v782_v48  ;;  %v1891_v3 = vunpack.i.l.bf16 %v2322_v16  ;;  %v1613_v35 = vld [vmem:[%s2788_s7 + $0x5] ss:$8 sm:$0x3] }
 0x201   : > { %v1907_v54 = vunpack.i.h.bf16 %v1905_v31  ;;  %v1906_v55 = vunpack.i.l.bf16 %v1905_v31  ;;  %v1872_v7 = vunpack.i.h.bf16 %v2317_v12  ;;  %v1871_v8 = vunpack.i.l.bf16 %v2317_v12 }
 0x202   : > { %v832_v16 = vrot.slane %v828_v36, %v2275_v44  ;;  %v1713_v2 = vpack.c.bf16 %v783_v59, %v781_v39  ;;  %v1841_v17 = vunpack.i.l.bf16 %v2267_v41  ;;  %vm2450_vm6 = vcmp.eq.s32.totalorder %v836_v37, 1 }
 0x203   : > { %1703 = vmatpush1.bf16.msk.msra.mxu1 %vm1702_vm14, %v1701_v61  ;;  %v786_v12 = vsel %vm780_vm0, %v1906_v55, %v1907_v54  ;;  %v1847_v26 = vunpack.i.h.bf16 %v2269_v42  ;;  %v879_v28 = vsel %vm875_vm5, %v1891_v3, %v1892_v63  ;;  %v877_v30 = vsel %vm875_vm5, %v1871_v8, %v1872_v7  ;;  %vm1723_vm8 = vmpackc.low %vm2450_vm6, %vm2450_vm6 }
 0x204   : > { %v2405_v49 = vpop.permute.xlu1 %1909  ;;  %v1950_v51 = vpop.permute.xlu0 %1949  ;;  %1706 = vmatprep.subr.msk.bf16.mxu1 %vm1699_vm13, %v1704_v32  ;;  %v785_v41 = vsel %vm780_vm0, %v1841_v17, %v1906_v55  ;;  %vm2471_vm7 = vcmp.eq.s32.totalorder %v832_v16, 1  ;;  %v1846_v36 = vunpack.i.l.bf16 %v2269_v42  ;;  %v1722_v48 = vpack.c.bf16 %v879_v28, %v877_v30 }
 0x205   : > { %v1952_v56 = vunpack.i.h.bf16 %v1950_v51  ;;  %v1951_v18 = vunpack.i.l.bf16 %v1950_v51  ;;  %v1912_v57 = vunpack.i.h.bf16 %v2405_v49  ;;  %v1911_v61 = vunpack.i.l.bf16 %v2405_v49  ;;  %v1616_v49 = vld [vmem:[%s2788_s7 + $0x10] ss:$8 sm:$0x3]  ;;  %vm1726_vm9 = vmpackc.low %vm2471_vm7, %vm2471_vm7 }
 0x206   : > { %v878_v47 = vsel %vm875_vm5, %v1847_v26, %v1891_v3  ;;  %v1852_v51 = vunpack.i.h.bf16 %v2278_v46  ;;  %v876_v54 = vsel %vm875_vm5, %v1846_v36, %v1871_v8  ;;  %vm938_vm10 = vcmp.ne.f32.partialorder %v1613_v35, 0.0 }
 0x207   : > { %v788_v6 = vsel %vm780_vm0, %v1951_v18, %v1952_v56  ;;  %1709 = vmatpush1.bf16.msk.msra.mxu1 %vm1702_vm14, %v1707_v45  ;;  %v787_v19 = vsel %vm780_vm0, %v1842_v62, %v1951_v18  ;;  %v1725_v52 = vpack.c.bf16 %v878_v47, %v876_v54  ;;  %v881_v56 = vsel %vm875_vm5, %v1911_v61, %v1912_v57 }
 0x208   : > { %v2434_v11 = vpop.permute.xlu1 %1924  ;;  %v2436_v15 = vpop.permute.xlu0 %1954  ;;  %1712 = vmatprep.subr.msk.bf16.mxu1 %vm1711_vm3, %v1710_v38  ;;  %v1716_v22 = vpack.c.bf16 %v788_v6, %v786_v12  ;;  %v1719_v13 = vpack.c.bf16 %v787_v19, %v785_v41  ;;  %v1851_v18 = vunpack.i.l.bf16 %v2278_v46  ;;  %vm1223_vm12 = vcmp.ne.f32.partialorder %v1616_v49, 0.0  ;;  %v1615_v38 = vld [vmem:[%s2788_s7 + $0x7] ss:$8 sm:$0x3] }
 0x209   : > { %v939_v37 = vsel %vm938_vm10, 1, %v2062_v1  ;;  %v1034_v62 = vsel %vm1033_vm11, 1, %v2062_v1  ;;  %v1224_v39 = vsel %vm1223_vm12, 1, %v2062_v1  ;;  %vm1128_vm13 = vcmp.ne.f32.partialorder %v1615_v38, 0.0 }
 0x20a   : > { %v880_v46 = vsel %vm875_vm5, %v1851_v18, %v1911_v61  ;;  %v947_v7 = vrot.slane %v939_v37, %v2272_v43  ;;  %v943_v8 = vrot.slane %v939_v37, %v2275_v44  ;;  %v1042_v16 = vrot.slane %v1034_v62, %v2272_v43 }
 0x20b   : > { %1715 = vmatpush1.bf16.msk.msra.mxu1 %vm1714_vm4, %v1713_v2  ;;  %v1922_v2 = vunpack.i.h.bf16 %v2334_v40  ;;  %v1921_v12 = vunpack.i.l.bf16 %v2334_v40  ;;  %v1927_v17 = vunpack.i.h.bf16 %v2434_v11  ;;  %v1926_v19 = vunpack.i.l.bf16 %v2434_v11 }
 0x20c   : > { %v2464_v27 = vpop.permute.xlu1 %1939  ;;  %v1965_v29 = vpop.permute.xlu0 %1964  ;;  %1718 = vmatprep.subr.msk.bf16.mxu1 %vm1711_vm3, %v1716_v22  ;;  %vm986_vm14 = vcmask 1039360   ;;  %v1232_v40 = vrot.slane %v1224_v39, %v2272_v43  ;;  %v2555_v26 = vsel %vm1128_vm13, 1, %v2062_v1  ;;  %vm2557_vm0 = vcmp.eq.s32.totalorder %v947_v7, 1 }
 0x20d   : > { %v1967_v4 = vunpack.i.h.bf16 %v1965_v29  ;;  %v1966_v32 = vunpack.i.l.bf16 %v1965_v29  ;;  %vm2561_vm1 = vcmp.eq.s32.totalorder %v943_v8, 1  ;;  %vm2565_vm2 = vcmp.eq.s32.totalorder %v1042_v16, 1 }
 0x20e   : > { %v1038_v53 = vrot.slane %v1034_v62, %v2275_v44  ;;  %v988_v0 = vsel %vm986_vm14, %v1921_v12, %v1922_v2  ;;  %v990_v1 = vsel %vm986_vm14, %v1926_v19, %v1927_v17  ;;  %vm1271_vm3 = vcmask 908288   ;;  %vm1746_vm7 = vmpackc.low %vm2561_vm1, %vm2561_vm1 }
 0x20f   : > { %v883_v45 = vsel %vm875_vm5, %v1966_v32, %v1967_v4  ;;  %1721 = vmatpush1.bf16.msk.msra.mxu1 %vm1714_vm4, %v1719_v13  ;;  %v882_v58 = vsel %vm875_vm5, %v1852_v51, %v1966_v32  ;;  %v1137_v41 = vrot.slane %v2555_v26, %v2272_v43  ;;  %v1937_v57 = vunpack.i.h.bf16 %v2380_v33  ;;  %vm1743_vm5 = vmpackc.low %vm2557_vm0, %vm2557_vm0 }
 0x210   : > { %v2498_v42 = vpop.permute.xlu1 %1944  ;;  %v2500_v55 = vpop.permute.xlu0 %1969  ;;  %1724 = vmatprep.subr.msk.bf16.mxu1 %vm1723_vm8, %v1722_v48  ;;  %v1728_v59 = vpack.c.bf16 %v883_v45, %v881_v56  ;;  %v1731_v6 = vpack.c.bf16 %v882_v58, %v880_v46  ;;  %v1936_v29 = vunpack.i.l.bf16 %v2380_v33  ;;  %v1957_v31 = vunpack.i.h.bf16 %v2436_v15  ;;  %vm1755_vm11 = vmpackc.low %vm2565_vm2, %vm2565_vm2  ;;  %v1304_v58 = vld [vmem:[%s2787_s6] sm:$0xff] }
 0x211   : > { %v1956_v61 = vunpack.i.l.bf16 %v2436_v15  ;;  %vm2587_vm4 = vcmp.eq.s32.totalorder %v1232_v40, 1  ;;  %v1942_v60 = vunpack.i.h.bf16 %v2464_v27  ;;  %v989_v15 = vsel %vm986_vm14, %v1937_v57, %v1926_v19 }
 0x212   : > { %v1742_v32 = vpack.c.bf16 %v990_v1, %v988_v0  ;;  %v1947_v14 = vunpack.i.h.bf16 %v2498_v42  ;;  %v1946_v21 = vunpack.i.l.bf16 %v2498_v42  ;;  %vm1176_vm6 = vcmask 916480   ;;  %vm1779_vm12 = vmpackc.low %vm2587_vm4, %vm2587_vm4 }
 0x213   : > { %1727 = vmatpush1.bf16.msk.msra.mxu1 %vm1726_vm9, %v1725_v52  ;;  %v987_v36 = vsel %vm986_vm14, %v1936_v29, %v1921_v12  ;;  %v1133_v20 = vrot.slane %v2555_v26, %v2275_v44  ;;  %v1083_v49 = vsel %vm1081_vm15, %v1956_v61, %v1957_v31  ;;  %v1972_v42 = vunpack.i.h.bf16 %v2500_v55 }
 0x214   : > { %v2524_v63 = vpop.permute.xlu1 %1959  ;;  %v2526_v3 = vpop.permute.xlu0 %1984  ;;  %1730 = vmatprep.subr.msk.bf16.mxu1 %vm1723_vm8, %v1728_v59  ;;  %vm2619_vm8 = vcmp.eq.s32.totalorder %v1038_v53, 1  ;;  %vm2635_vm10 = vcmp.eq.s32.totalorder %v1137_v41, 1  ;;  %vm1379_vm2 = vcmask 261120  }
 0x215   : > { %v1962_v35 = vunpack.i.h.bf16 %v2524_v63  ;;  %v1961_v34 = vunpack.i.l.bf16 %v2524_v63  ;;  %v1987_v37 = vunpack.i.h.bf16 %v2526_v3  ;;  %v1986_v17 = vunpack.i.l.bf16 %v2526_v3  ;;  %vm1758_vm13 = vmpackc.low %vm2619_vm8, %vm2619_vm8 }
 0x217   : > { %1733 = vmatpush1.bf16.msk.msra.mxu1 %vm1726_vm9, %v1731_v6  ;;  %v1085_v38 = vsel %vm1081_vm15, %v1961_v34, %v1962_v35 }
 0x218   : > { %v2546_v22 = vpop.permute.xlu1 %1974  ;;  %v2548_v24 = vpop.permute.xlu0 %1994  ;;  %1735 = vmatprep.subr.bf16.mxu1 %v1734_v9  ;;  %v1228_v9 = vrot.slane %v1224_v39, %v2275_v44  ;;  %v1754_v12 = vpack.c.bf16 %v1085_v38, %v1083_v49 }
 0x219   : > { %v1997_v52 = vunpack.i.h.bf16 %v2548_v24  ;;  %v1996_v56 = vunpack.i.l.bf16 %v2548_v24  ;;  %v1977_v62 = vunpack.i.h.bf16 %v2546_v22  ;;  %v1976_v46 = vunpack.i.l.bf16 %v2546_v22 }
 0x21a   : > { %vm2623_vm9 = vcmp.eq.s32.totalorder %v1228_v9, 1 }
 0x21b   : > { %1737 = vmatpush1.bf16.msra.mxu1 %v1736_v5  ;;  %v1941_v5 = vunpack.i.l.bf16 %v2464_v27  ;;  %v1273_v19 = vsel %vm1271_vm3, %v1996_v56, %v1997_v52  ;;  %v1087_v28 = vsel %vm1081_vm15, %v1976_v46, %v1977_v62  ;;  %vm1782_vm0 = vmpackc.low %vm2623_vm9, %vm2623_vm9 }
 0x21c   : > { %v2582_v13 = vpop.permute.xlu1 %1979  ;;  %v2005_v4 = vpop.permute.xlu0 %2004  ;;  %1739 = vmatprep.subr.bf16.mxu1 %v1738_v25  ;;  %v1971_v25 = vunpack.i.l.bf16 %v2500_v55  ;;  %v1084_v55 = vsel %vm1081_vm15, %v1972_v42, %v1961_v34 }
 0x21d   : > { %v2007_v43 = vunpack.i.h.bf16 %v2005_v4  ;;  %v2006_v33 = vunpack.i.l.bf16 %v2005_v4  ;;  %v992_v51 = vsel %vm986_vm14, %v1941_v5, %v1942_v60  ;;  %v991_v44 = vsel %vm986_vm14, %v1946_v21, %v1941_v5 }
 0x21e   : > { %v1082_v59 = vsel %vm1081_vm15, %v1971_v25, %v1956_v61  ;;  %v1981_v22 = vunpack.i.l.bf16 %v2582_v13  ;;  %v1982_v53 = vunpack.i.h.bf16 %v2582_v13  ;;  %v1178_v61 = vsel %vm1176_vm6, %v1986_v17, %v1987_v37 }
 0x21f   : > { %v994_v27 = vsel %vm986_vm14, %v2006_v33, %v2007_v43  ;;  %1741 = vmatpush1.bf16.msra.mxu1 %v1740_v23  ;;  %v1745_v23 = vpack.c.bf16 %v989_v15, %v987_v36  ;;  %v993_v54 = vsel %vm986_vm14, %v1947_v14, %v2006_v33  ;;  %v1757_v3 = vpack.c.bf16 %v1084_v55, %v1082_v59 }
 0x220   : > { %v2607_v47 = vpop.permute.xlu1 %1989  ;;  %v2609_v48 = vpop.permute.xlu0 %2009  ;;  %1744 = vmatprep.subr.msk.bf16.mxu1 %vm1743_vm5, %v1742_v32  ;;  %v1748_v18 = vpack.c.bf16 %v994_v27, %v992_v51  ;;  %v1751_v63 = vpack.c.bf16 %v993_v54, %v991_v44  ;;  %vm2693_vm14 = vcmp.eq.s32.totalorder %v1133_v20, 1  ;;  %v1086_v5 = vsel %vm1081_vm15, %v1981_v22, %v1976_v46 }
 0x221   : > { %v1992_v24 = vunpack.i.h.bf16 %v2607_v47  ;;  %v1991_v40 = vunpack.i.l.bf16 %v2607_v47  ;;  %v2012_v0 = vunpack.i.h.bf16 %v2609_v48  ;;  %v2011_v57 = vunpack.i.l.bf16 %v2609_v48  ;;  %vm1770_vm1 = vmpackc.low %vm2693_vm14, %vm2693_vm14 }
 0x223   : > { %1747 = vmatpush1.bf16.msk.msra.mxu1 %vm1746_vm7, %v1745_v23  ;;  %v1180_v43 = vsel %vm1176_vm6, %v1991_v40, %v1992_v24  ;;  %v1179_v32 = vsel %vm1176_vm6, %v2012_v0, %v1991_v40  ;;  %v1177_v27 = vsel %vm1176_vm6, %v2011_v57, %v1986_v17 }
 0x224   : > { %v2000_v6 = vpop.permute.xlu1 %1999  ;;  %v2020_v39 = vpop.permute.xlu0 %2019  ;;  %1750 = vmatprep.subr.msk.bf16.mxu1 %vm1743_vm5, %v1748_v18  ;;  %v1766_v20 = vpack.c.bf16 %v1180_v43, %v1178_v61  ;;  %v1769_v51 = vpack.c.bf16 %v1179_v32, %v1177_v27 }
 0x225   : > { %v2002_v7 = vunpack.i.h.bf16 %v2000_v6  ;;  %v2001_v8 = vunpack.i.l.bf16 %v2000_v6  ;;  %v2022_v16 = vunpack.i.h.bf16 %v2020_v39  ;;  %v2021_v2 = vunpack.i.l.bf16 %v2020_v39 }
 0x227   : > { %v1275_v26 = vsel %vm1271_vm3, %v2001_v8, %v2002_v7  ;;  %v1089_v11 = vsel %vm1081_vm15, %v2021_v2, %v2022_v16  ;;  %1753 = vmatpush1.bf16.msk.msra.mxu1 %vm1746_vm7, %v1751_v63  ;;  %v1088_v13 = vsel %vm1081_vm15, %v1982_v53, %v2021_v2  ;;  %vm1767_vm15 = vmpackc.low %vm2635_vm10, %vm2635_vm10 }
 0x228   : > { %v1778_v1 = vpack.c.bf16 %v1275_v26, %v1273_v19  ;;  %v2015_v9 = vpop.permute.xlu1 %2014  ;;  %v2025_v41 = vpop.permute.xlu0 %2024  ;;  %1756 = vmatprep.subr.msk.bf16.mxu1 %vm1755_vm11, %v1754_v12  ;;  %v1760_v4 = vpack.c.bf16 %v1089_v11, %v1087_v28  ;;  %v1763_v36 = vpack.c.bf16 %v1088_v13, %v1086_v5 }
 0x229   : > { %v2017_v29 = vunpack.i.h.bf16 %v2015_v9  ;;  %v2016_v31 = vunpack.i.l.bf16 %v2015_v9  ;;  %v2027_v21 = vunpack.i.h.bf16 %v2025_v41  ;;  %v2026_v25 = vunpack.i.l.bf16 %v2025_v41 }
 0x22a   : > { %1780 = vmatprep.subr.msk.bf16.mxu0 %vm1779_vm12, %v1778_v1 }
 0x22b   : > { %v1272_v33 = vsel %vm1271_vm3, %v2016_v31, %v1996_v56  ;;  %v1274_v15 = vsel %vm1271_vm3, %v2017_v29, %v2001_v8  ;;  %1759 = vmatpush1.bf16.msk.msra.mxu1 %vm1758_vm13, %v1757_v3  ;;  %v1182_v54 = vsel %vm1176_vm6, %v2026_v25, %v2027_v21 }
 0x22c   : > { %v1781_v14 = vpack.c.bf16 %v1274_v15, %v1272_v33  ;;  %v2035_v35 = vpop.permute.xlu1 %2034  ;;  %v2030_v34 = vpop.permute.xlu0 %2029  ;;  %1762 = vmatprep.subr.msk.bf16.mxu1 %vm1755_vm11, %v1760_v4 }
 0x22d   : > { %v2037_v47 = vunpack.i.h.bf16 %v2035_v35  ;;  %v2036_v48 = vunpack.i.l.bf16 %v2035_v35  ;;  %v2032_v23 = vunpack.i.h.bf16 %v2030_v34  ;;  %v2031_v49 = vunpack.i.l.bf16 %v2030_v34 }
 0x22e   : > { %1783 = vmatpush1.bf16.msk.msra.mxu0 %vm1782_vm0, %v1781_v14 }
 0x22f   : > { %v1184_v30 = vsel %vm1176_vm6, %v2036_v48, %v2037_v47  ;;  %1765 = vmatpush1.bf16.msk.msra.mxu1 %vm1758_vm13, %v1763_v36  ;;  %v1277_v38 = vsel %vm1271_vm3, %v2031_v49, %v2032_v23 }
 0x230   : > { %v2040_v42 = vpop.permute.xlu1 %2039  ;;  %v2045_v52 = vpop.permute.xlu0 %2044  ;;  %1768 = vmatprep.subr.msk.bf16.mxu1 %vm1767_vm15, %v1766_v20  ;;  %v1772_v59 = vpack.c.bf16 %v1184_v30, %v1182_v54 }
 0x231   : > { %v2042_v56 = vunpack.i.h.bf16 %v2040_v42  ;;  %v2041_v18 = vunpack.i.l.bf16 %v2040_v42  ;;  %v2047_v45 = vunpack.i.h.bf16 %v2045_v52  ;;  %v2046_v44 = vunpack.i.l.bf16 %v2045_v52 }
 0x233   : > { %v1279_v37 = vsel %vm1271_vm3, %v2041_v18, %v2042_v56  ;;  %v1183_v55 = vsel %vm1176_vm6, %v2047_v45, %v2036_v48  ;;  %v1181_v62 = vsel %vm1176_vm6, %v2046_v44, %v2026_v25  ;;  %1771 = vmatpush1.bf16.msk.msra.mxu1 %vm1770_vm1, %v1769_v51 }
 0x234   : > { %v1784_v46 = vpack.c.bf16 %v1279_v37, %v1277_v38  ;;  %v1775_v63 = vpack.c.bf16 %v1183_v55, %v1181_v62  ;;  %v2050_v6 = vpop.permute.xlu1 %2049  ;;  %1774 = vmatprep.subr.msk.bf16.mxu1 %vm1767_vm15, %v1772_v59 }
 0x235   : > { %v2052_v39 = vunpack.i.h.bf16 %v2050_v6  ;;  %v2051_v7 = vunpack.i.l.bf16 %v2050_v6 }
 0x236   : > { %1786 = vmatprep.subr.msk.bf16.mxu0 %vm1779_vm12, %v1784_v46 }
 0x237   : > { %v1276_v8 = vsel %vm1271_vm3, %v2051_v7, %v2031_v49  ;;  %v1278_v16 = vsel %vm1271_vm3, %v2052_v39, %v2041_v18  ;;  %1777 = vmatpush1.bf16.msk.msra.mxu1 %vm1770_vm1, %v1775_v63 }
 0x238   : > { %v1787_v2 = vpack.c.bf16 %v1278_v16, %v1276_v8 }
 0x23a   : > { %1789 = vmatpush1.bf16.msk.msra.mxu0 %vm1782_vm0, %v1787_v2  ;;  %1448 = vmatmul.mubr.f32.vlgmr.msra.gmra.mrb[0].mxu1 %v1304_v58 }
 0x23d   : > { %1617 = vmatmul.mubr.msk.f32.vlgmr.msra.gmra.mrb[8].mxu0 %vm1379_vm2, %v1306_v50 }
 0x30d   : > { %v1449_v12 = vpop.f32.mrb[0].mxu1 }
 0x30e   : > { %v1451_v17 = vpop.f32.mrb[1].mxu1 }
 0x310   : > { %v1520_v19 = vpop.f32.mrb[8].mxu0 }
 0x311   : > { %v1521_v22 = vadd.f32 %v1520_v19, %v1449_v12  ;;  %v1522_v24 = vpop.f32.mrb[9].mxu0 }
 0x312   : > { %v1523_v40 = vadd.f32 %v1522_v24, %v1451_v17 }
 0x313   : > { %v1532_v26 = vrot.slane %v1521_v22, 4 }
 0x314   : > { %v1533_v11 = vrot.slane %v1523_v40, 4 }
 0x315   : > { %1536 = vst [vmem:[%s2140_s18 + $0x10] ss:$-12 sps:$4 sm:$0xff] %v1532_v26  }
 0x316   : > { %1537 = vst [vmem:[%s2140_s18 + $0x18] ss:$-12 sps:$4 sm:$0xff] %v1533_v11  }
 0x317 PF: > { %s18_s27 = sadd.s32 1, %s2060_s27  }
 0x318   : > { %p15_p4 = scmp.ge.s32.totalorder %s18_s27, 4  }
 0x31a   :  { %17 = sbr.rel (!%p15_p4) target bundleno = 1 (0x1), region = 89 }

</bundles_post_ra>
